<compile_context>
chip_gen: v7x
topology: tpu7x:2x2x1
jax: 0.10.0
libtpu: 0.0.40
codegen_flags: <defaults>
</compile_context>

<pallas_src>
import functools
import jax
import jax.numpy as jnp
from jax.experimental import pallas as pl
from jax.experimental.pallas import tpu as pltpu


# ----------------------------------------------------------------------------
# helpers
# ----------------------------------------------------------------------------
LANE = 128


def round_up(x, m):
    return (x + m - 1) // m * m


def _choose_tm(M):
    # Full-M block (uses the "block dim == full array dim" escape, no padding)
    # when small; otherwise 512-row tiles (masked tail block).
    return M if M <= 512 else 512


def _choose_tk(Kp, cap=1024, full_max=1536):
    if Kp <= full_max:
        return Kp
    for step in (256, 128):                 # prefer 256-wide MXU-aligned tiles
        t = (cap // step) * step
        while t >= step:
            if Kp % t == 0:
                return t
            t -= step
    return Kp


def _choose_tn(Np, cap=512):
    if Np <= cap:
        return Np
    for step in (256, 128):
        t = (cap // step) * step
        while t >= step:
            if Np % t == 0:
                return t
            t -= step
    return Np


# ----------------------------------------------------------------------------
# Pallas kernel 1: tiled matmul with fused per-column affine + activation and
# an optional fused extra element-wise operand:
#   Y = ext_op( act( (X @ W) * scale + shift ), E )
# X, W, E are bf16; accumulation and the epilogue run in f32.
# ----------------------------------------------------------------------------
def _mm_kernel(*refs, act, slope, ext_op):
    if ext_op is None:
        x_ref, w_ref, s_ref, b_ref, o_ref, acc_ref = refs
        e_ref = None
    else:
        x_ref, w_ref, s_ref, b_ref, e_ref, o_ref, acc_ref = refs

    k = pl.program_id(2)

    @pl.when(k == 0)
    def _():
        acc_ref[...] = jnp.zeros_like(acc_ref)

    acc_ref[...] += jnp.dot(x_ref[...], w_ref[...],
                            preferred_element_type=jnp.float32)

    @pl.when(k == pl.num_programs(2) - 1)
    def _():
        y = acc_ref[...] * s_ref[...] + b_ref[...]
        if act == "relu":
            y = jnp.maximum(y, 0.0)
        elif act == "leaky":
            y = jnp.where(y >= 0.0, y, y * slope)
        if ext_op == "add":
            y = y + e_ref[...].astype(jnp.float32)
        elif ext_op == "mul":
            y = y * e_ref[...].astype(jnp.float32)
        elif ext_op == "add_relu":
            y = jnp.maximum(y + e_ref[...].astype(jnp.float32), 0.0)
        o_ref[...] = y.astype(o_ref.dtype)


def pallas_matmul_affine(colmat, pconv, act="none", slope=0.01,
                         extra=None, extra_op=None):
    """colmat: (M, K) bf16 activations; pconv holds pre-padded (Kp, Np) bf16 W."""
    M, K = colmat.shape
    Kp, Np = pconv["wmat"].shape
    N = pconv["cout"]

    if Kp != K:                      # only the tiny stem convs (K=27 / 576)
        colmat = jnp.pad(colmat, ((0, 0), (0, Kp - K)))

    tm = _choose_tm(M)
    tk = _choose_tk(Kp)
    tn = _choose_tn(Np)
    grid_m = -(-M // tm)
    # keep both v7x TensorCores busy: never let the (i, j) grid collapse to 1x1
    if grid_m == 1 and Np // tn == 1 and Np >= 256 and (Np // 2) % LANE == 0:
        tn = Np // 2
    grid = (grid_m, Np // tn, Kp // tk)

    args = [colmat, pconv["wmat"], pconv["scale"], pconv["shift"]]
    in_specs = [
        pl.BlockSpec((tm, tk), lambda i, j, k: (i, k)),
        pl.BlockSpec((tk, tn), lambda i, j, k: (k, j)),
        pl.BlockSpec((1, tn), lambda i, j, k: (0, j)),
        pl.BlockSpec((1, tn), lambda i, j, k: (0, j)),
    ]
    if extra is not None:
        assert extra_op in ("add", "mul", "add_relu")
        assert Np == N and extra.shape == (M, N), (extra.shape, M, N, Np)
        args.append(extra)
        in_specs.append(pl.BlockSpec((tm, tn), lambda i, j, k: (i, j)))

    kernel = functools.partial(_mm_kernel, act=act, slope=slope, ext_op=extra_op)
    out = pl.pallas_call(
        kernel,
        out_shape=jax.ShapeDtypeStruct((M, Np), jnp.float32),
        grid_spec=pltpu.PrefetchScalarGridSpec(
            num_scalar_prefetch=0,
            grid=grid,
            in_specs=in_specs,
            out_specs=pl.BlockSpec((tm, tn), lambda i, j, k: (i, j)),
            scratch_shapes=[pltpu.VMEM((tm, tn), jnp.float32)],
        ),
        compiler_params=pltpu.CompilerParams(
            dimension_semantics=("parallel", "parallel", "arbitrary")),
    )(*args)

    if Np != N:
        out = out[:, :N]
    return out


# ----------------------------------------------------------------------------
# Pallas kernel 2: element-wise add on the natural (rows, C) view (C % 128 == 0)
# ----------------------------------------------------------------------------
def _ew_add_kernel(a_ref, b_ref, o_ref):
    o_ref[...] = a_ref[...] + b_ref[...]


def pallas_elementwise_add(a, b):
    assert a.shape == b.shape
    shape = a.shape
    C = shape[-1]
    assert C % LANE == 0, C
    M = a.size // C
    a2 = a.reshape(M, C)
    b2 = b.reshape(M, C)
    tc = 512 if (C > 512 and C % 512 == 0) else C
    tr = M if M <= 512 else 512
    grid = (-(-M // tr), C // tc)
    spec = pl.BlockSpec((tr, tc), lambda i, j: (i, j))
    out = pl.pallas_call(
        _ew_add_kernel,
        out_shape=jax.ShapeDtypeStruct((M, C), jnp.float32),
        grid=grid,
        in_specs=[spec, spec],
        out_specs=spec,
        compiler_params=pltpu.CompilerParams(
            dimension_semantics=("parallel", "parallel")),
    )(a2, b2)
    return out.reshape(shape)


# ----------------------------------------------------------------------------
# Pallas kernel 3: max pooling — the k*k window taps are passed as k*k operands
# (no stacked HBM tensor) and maxed element-wise in a single pass.
# TODO(synk): read the padded input once per row block (strided in-kernel
# window max) instead of materialising the k*k XLA tap slices.
# ----------------------------------------------------------------------------
def _max_kernel(*refs):
    o_ref = refs[-1]
    r = refs[0][...]
    for t_ref in refs[1:-1]:
        r = jnp.maximum(r, t_ref[...])
    o_ref[...] = r


def max_pool2d(x, k, s, p, ceil_mode=False):
    N, H, W, C = x.shape

    def out_size(L):
        if ceil_mode:
            o = -(-(L + 2 * p - k) // s) + 1
            if (o - 1) * s >= L + p:
                o -= 1
        else:
            o = (L + 2 * p - k) // s + 1
        return o

    Ho, Wo = out_size(H), out_size(W)
    ph_r = max(0, (Ho - 1) * s + k - (H + p))
    pw_r = max(0, (Wo - 1) * s + k - (W + p))
    if p or ph_r or pw_r:
        x = jnp.pad(x, ((0, 0), (p, ph_r), (p, pw_r), (0, 0)),
                    constant_values=-jnp.inf)

    M = N * Ho * Wo
    taps = [x[:, di: di + s * (Ho - 1) + 1: s,
               dj: dj + s * (Wo - 1) + 1: s, :].reshape(M, C)
            for di in range(k) for dj in range(k)]

    tc = 512 if (C > 512 and C % 512 == 0) else C
    tr = M if M <= 512 else 256
    grid = (-(-M // tr), C // tc)
    spec = pl.BlockSpec((tr, tc), lambda i, j: (i, j))
    out = pl.pallas_call(
        _max_kernel,
        out_shape=jax.ShapeDtypeStruct((M, C), jnp.float32),
        grid=grid,
        in_specs=[spec] * len(taps),
        out_specs=spec,
        compiler_params=pltpu.CompilerParams(
            dimension_semantics=("parallel", "parallel")),
    )(*taps)
    return out.reshape(N, Ho, Wo, C)


# ----------------------------------------------------------------------------
# conv / pool / upsample wrappers (NHWC layout, Pallas hot path)
# ----------------------------------------------------------------------------
def conv2d_p(x, pconv, stride=1, padding=0, dilation=1, act="none", slope=0.01,
             extra=None, extra_op=None):
    """x: (N,H,W,C) f32. pconv: prepared conv (bf16 (Kp,Np) weight matrix)."""
    N, H, W, C = x.shape
    kh, kw, cin, cout = pconv["kh"], pconv["kw"], pconv["cin"], pconv["cout"]
    assert C == cin, (C, cin)
    Ho = (H + 2 * padding - dilation * (kh - 1) - 1) // stride + 1
    Wo = (W + 2 * padding - dilation * (kw - 1) - 1) // stride + 1

    xb = x.astype(jnp.bfloat16)
    if kh == 1 and kw == 1 and padding == 0 and dilation == 1:
        xs = xb if stride == 1 else xb[:, ::stride, ::stride, :]
        col = xs.reshape(N * Ho * Wo, C)
    else:
        # TODO(synk): fold the kh*kw tap gather into the matmul kernel's
        # index_map (shifted-window DMA) so the im2col matrix never hits HBM.
        xp = (jnp.pad(xb, ((0, 0), (padding, padding), (padding, padding), (0, 0)))
              if padding else xb)
        taps = []
        for i in range(kh):
            for j in range(kw):
                taps.append(
                    xp[:, i * dilation: i * dilation + stride * (Ho - 1) + 1: stride,
                          j * dilation: j * dilation + stride * (Wo - 1) + 1: stride, :])
        col = jnp.concatenate(taps, axis=-1).reshape(N * Ho * Wo, kh * kw * C)

    e2 = None
    if extra is not None:
        e2 = extra.reshape(N * Ho * Wo, cout).astype(jnp.bfloat16)
    out = pallas_matmul_affine(col, pconv, act=act, slope=slope,
                               extra=e2, extra_op=extra_op)
    return out.reshape(N, Ho, Wo, cout)


def conv_transpose2d(x, pdec, extra=None):
    """nn.ConvTranspose2d(k=3, stride=2, padding=1) via the 4-phase sub-pixel
    decomposition (4 small stride-1 convs + interleave); `extra` is added to
    the output (fused into each phase's matmul epilogue)."""
    N, H, W, _ = x.shape
    Ho, Wo = 2 * H - 1, 2 * W - 1
    if extra is not None:
        e_ee, e_eo = extra[:, 0::2, 0::2], extra[:, 0::2, 1::2]
        e_oe, e_oo = extra[:, 1::2, 0::2], extra[:, 1::2, 1::2]
        op = "add"
    else:
        e_ee = e_eo = e_oe = e_oo = None
        op = None

    ee = conv2d_p(x, pdec["ee"], padding=0, extra=e_ee, extra_op=op)  # (N,H,  W,  O)
    eo = conv2d_p(x, pdec["eo"], padding=0, extra=e_eo, extra_op=op)  # (N,H,  W-1,O)
    oe = conv2d_p(x, pdec["oe"], padding=0, extra=e_oe, extra_op=op)  # (N,H-1,W,  O)
    oo = conv2d_p(x, pdec["oo"], padding=0, extra=e_oo, extra_op=op)  # (N,H-1,W-1,O)

    out = jnp.zeros((N, Ho, Wo, ee.shape[-1]), ee.dtype)
    out = out.at[:, 0::2, 0::2].set(ee)
    out = out.at[:, 0::2, 1::2].set(eo)
    out = out.at[:, 1::2, 0::2].set(oe)
    out = out.at[:, 1::2, 1::2].set(oo)
    return out


def adaptive_avg_pool(x, s):
    N, H, W, C = x.shape
    rows = []
    for i in range(s):
        h0 = (i * H) // s
        h1 = -(-((i + 1) * H) // s)
        cols = []
        for j in range(s):
            w0 = (j * W) // s
            w1 = -(-((j + 1) * W) // s)
            cols.append(jnp.mean(x[:, h0:h1, w0:w1, :], axis=(1, 2)))  # (N,C)
        rows.append(jnp.stack(cols, axis=1))     # (N, s, C)
    return jnp.stack(rows, axis=1)               # (N, s, s, C)


def upsample_bilinear_ac(x, out_hw):
    """F.upsample(mode='bilinear', align_corners=True), NHWC."""
    N, H, W, C = x.shape
    Ho, Wo = out_hw
    if Ho == H and Wo == W:
        return x

    def coords(Li, Lo):
        if Lo == 1:
            src = jnp.zeros((Lo,), jnp.float32)
        else:
            src = jnp.arange(Lo, dtype=jnp.float32) * ((Li - 1) / (Lo - 1))
        lo = jnp.clip(jnp.floor(src).astype(jnp.int32), 0, Li - 1)
        hi = jnp.clip(lo + 1, 0, Li - 1)
        frac = src - lo.astype(jnp.float32)
        return lo, hi, frac

    y0, y1, wy = coords(H, Ho)
    x0, x1, wx = coords(W, Wo)
    top = x[:, y0, :, :]
    bot = x[:, y1, :, :]
    wxb = wx[None, None, :, None]

    def hor(t):
        return t[:, :, x0, :] * (1.0 - wxb) + t[:, :, x1, :] * wxb

    t, b = hor(top), hor(bot)
    wyb = wy[None, :, None, None]
    return t * (1.0 - wyb) + b * wyb


# ----------------------------------------------------------------------------
# deterministic parameter construction (pre-reshaped, pre-padded, bf16 weights)
# ----------------------------------------------------------------------------
_BASE_KEY = jax.random.PRNGKey(0)
_KCTR = [0]


def nk():
    _KCTR[0] += 1
    return jax.random.fold_in(_BASE_KEY, _KCTR[0])


def prep_conv_affine(w_ochw, scale, shift):
    """w: (O,C,kh,kw) -> pre-padded bf16 (Kp,Np) matrix; scale/shift -> (1,Np) f32."""
    O, C, kh, kw = w_ochw.shape
    K = kh * kw * C
    Kp, Np = round_up(K, LANE), round_up(O, LANE)
    wmat = w_ochw.transpose(2, 3, 1, 0).reshape(K, O)   # (tap, channel) x out
    wmat = jnp.pad(wmat, ((0, Kp - K), (0, Np - O))).astype(jnp.bfloat16)
    s = jnp.pad(scale.reshape(1, O).astype(jnp.float32), ((0, 0), (0, Np - O)))
    b = jnp.pad(shift.reshape(1, O).astype(jnp.float32), ((0, 0), (0, Np - O)))
    return {"wmat": wmat, "scale": s, "shift": b,
            "kh": kh, "kw": kw, "cin": C, "cout": O}


def make_pconv(o, i, kh, kw, bias=False, bn=False):
    std = (2.0 / (i * kh * kw)) ** 0.5 * 0.5
    w = jax.random.normal(nk(), (o, i, kh, kw), jnp.float32) * std
    b = (jax.random.normal(nk(), (o,), jnp.float32) * 0.01 if bias
         else jnp.zeros((o,), jnp.float32))
    if bn:
        eps = 1e-5
        gamma = jax.random.uniform(nk(), (o,), jnp.float32, 0.5, 1.5)
        beta = jax.random.normal(nk(), (o,), jnp.float32) * 0.1
        mean = jnp.zeros((o,), jnp.float32)
        var = jnp.ones((o,), jnp.float32)
        scale = gamma / jnp.sqrt(var + eps)
        shift = beta - mean * scale + b * scale
    else:
        scale = jnp.ones((o,), jnp.float32)
        shift = b
    return prep_conv_affine(w, scale, shift)


def make_deconv_p(i, o, kh, kw):
    """ConvTranspose2d(k=3,s=2,p=1) weights -> 4 sub-pixel phase convs."""
    std = (2.0 / (i * kh * kw)) ** 0.5 * 0.5
    w = jax.random.normal(nk(), (i, o, kh, kw), jnp.float32) * std   # (I,O,3,3)
    b = jax.random.normal(nk(), (o,), jnp.float32) * 0.01
    one = jnp.ones((o,), jnp.float32)

    def prep(sub_iokk):                                  # (I,O,ky,kx) -> conv
        return prep_conv_affine(jnp.transpose(sub_iokk, (1, 0, 2, 3)), one, b)

    w_ee = w[:, :, 1:2, 1:2]                                          # (I,O,1,1)
    w_eo = jnp.stack([w[:, :, 1, 2], w[:, :, 1, 0]], axis=-1)[:, :, None, :]
    w_oe = jnp.stack([w[:, :, 2, 1], w[:, :, 0, 1]], axis=-1)[:, :, :, None]
    w_oo = jnp.stack([jnp.stack([w[:, :, 2, 2], w[:, :, 2, 0]], axis=-1),
                      jnp.stack([w[:, :, 0, 2], w[:, :, 0, 0]], axis=-1)],
                     axis=-2)                                          # (I,O,2,2)
    return {"ee": prep(w_ee), "eo": prep(w_eo), "oe": prep(w_oe), "oo": prep(w_oo)}


def make_layer(inplanes, planes, blocks, stride, dilation):
    """Standard ResNet Bottleneck layer (expansion=4), multi_grid is always 1."""
    expansion = 4
    layer = []
    for bidx in range(blocks):
        s = stride if bidx == 0 else 1
        inp = inplanes if bidx == 0 else planes * expansion
        bp = {
            "conv1": make_pconv(planes, inp, 1, 1, bn=True),
            "conv2": make_pconv(planes, planes, 3, 3, bn=True),
            "conv3": make_pconv(planes * expansion, planes, 1, 1, bn=True),
            "stride": s,
            "dilation": dilation,
        }
        if bidx == 0 and (stride != 1 or inplanes != planes * expansion):
            bp["downsample"] = make_pconv(planes * expansion, inplanes, 1, 1, bn=True)
        layer.append(bp)
    return layer, planes * expansion


def build_params(layers, num_classes):
    p = {}
    p["conv1"] = make_pconv(64, 3, 3, 3, bn=True)
    p["conv2"] = make_pconv(64, 64, 3, 3, bn=True)
    p["conv3"] = make_pconv(128, 64, 3, 3, bn=True)
    inplanes = 128
    p["layer1"], inplanes = make_layer(inplanes, 64, layers[0], 1, 1)
    p["layer2"], inplanes = make_layer(inplanes, 128, layers[1], 2, 1)
    p["layer3"], inplanes = make_layer(inplanes, 256, layers[2], 1, 2)
    p["layer4"], inplanes = make_layer(inplanes, 512, layers[3], 1, 4)

    p["psp_stages"] = [make_pconv(256, 2048, 1, 1, bn=True) for _ in (1, 2, 3, 6)]
    p["psp_bottleneck"] = make_pconv(256, 2048 + 4 * 256, 3, 3, bn=True)

    p["dsn_conv1"] = make_pconv(512, 1024, 3, 3, bias=True, bn=True)
    p["dsn_conv2"] = make_pconv(num_classes, 512, 1, 1, bias=True)

    # TODO(synk): CCP module source not provided in the reference; stand-in is a
    # same-padding 3x3 conv (256 -> 512) + ReLU so downstream shapes match.
    p["ccp"] = make_pconv(512, 256, 3, 3, bias=True)
    p["ccp2"] = make_pconv(512, 256, 3, 3, bias=True)

    p["head"] = make_pconv(num_classes, 256, 1, 1, bias=True)
    p["down_conv"] = make_pconv(256, 256, 3, 3, bias=True)
    p["ccp2_conv"] = make_pconv(256, 256, 3, 3, bias=True)  # present but unused (matches PyTorch forward)
    p["conv_inductionA"] = make_pconv(512, 512, 3, 3, bias=True)
    p["conv_inductionB"] = make_pconv(256, 512, 3, 3, bias=True)
    p["conv_inductionC"] = make_pconv(512, 512, 3, 3, bias=True)
    p["conv_inductionD"] = make_pconv(256, 512, 3, 3, bias=True)
    p["deconv"] = make_deconv_p(256, 256, 3, 3)
    p["conv_ccp"] = make_pconv(512, 512, 3, 3, bias=True)
    p["conv_res4"] = make_pconv(512, 1024, 3, 3, bias=True)
    p["conv_res3"] = make_pconv(512, 512, 3, 3, bias=True)
    p["conv_res2"] = make_pconv(256, 256, 3, 3, bias=True)
    return p


# ----------------------------------------------------------------------------
# forward pass (NHWC)
# ----------------------------------------------------------------------------
def bottleneck_forward(bp, x):
    s, d = bp["stride"], bp["dilation"]
    out = conv2d_p(x, bp["conv1"], padding=0, act="relu")
    out = conv2d_p(out, bp["conv2"], stride=s, padding=d, dilation=d, act="relu")
    if "downsample" in bp:
        residual = conv2d_p(x, bp["downsample"], stride=s, padding=0, act="none")
    else:
        residual = x
    # bn3 (no activation) + residual add + relu fused into the conv3 epilogue
    return conv2d_p(out, bp["conv3"], padding=0, act="none",
                    extra=residual, extra_op="add_relu")


def run_layer(layer, x):
    for bp in layer:
        x = bottleneck_forward(bp, x)
    return x


def psp_forward(p, feats):
    h, w = feats.shape[1], feats.shape[2]
    priors = []
    for pconv, size in zip(p["psp_stages"], (1, 2, 3, 6)):
        pooled = adaptive_avg_pool(feats, size)
        y = conv2d_p(pooled, pconv, padding=0, act="leaky")
        priors.append(upsample_bilinear_ac(y, (h, w)))
    priors.append(feats)
    cat = jnp.concatenate(priors, axis=-1)
    # bottleneck conv + InPlaceABNSync(leaky) + Dropout2d(eval=identity), then the
    # module's outer ReLU: relu(leaky_relu(z)) == relu(z), fused as "relu".
    return conv2d_p(cat, p["psp_bottleneck"], padding=1, act="relu")


def dsn_forward(p, x):
    y = conv2d_p(x, p["dsn_conv1"], padding=1, act="leaky")
    # Dropout2d(0.1): identity at inference
    return conv2d_p(y, p["dsn_conv2"], padding=0)


def mul_into_conv(feat1, x_in, pconv, padding=1):
    """element_wise_multiplication(feat1, conv(x_in)) with the multiply fused
    into the conv matmul epilogue (conv is same-padding 3x3, stride 1)."""
    H2, W2 = x_in.shape[1], x_in.shape[2]
    assert feat1.shape[1] <= H2 and feat1.shape[2] <= W2
    if (feat1.shape[1], feat1.shape[2]) != (H2, W2):
        feat1 = upsample_bilinear_ac(feat1, (H2, W2))
    return conv2d_p(x_in, pconv, padding=padding, extra=feat1, extra_op="mul")


def resnet_forward(p, x):
    x = conv2d_p(x, p["conv1"], stride=2, padding=1, act="relu")
    x = conv2d_p(x, p["conv2"], padding=1, act="relu")
    x = conv2d_p(x, p["conv3"], padding=1, act="relu")
    x_pool = max_pool2d(x, 3, 2, 1, ceil_mode=True)

    res2 = run_layer(p["layer1"], x_pool)
    res3 = run_layer(p["layer2"], res2)
    res4 = run_layer(p["layer3"], res3)
    x_dsn = dsn_forward(p, res4)
    res5 = run_layer(p["layer4"], res4)

    x_psp = psp_forward(p, res5)

    # CCP2 branch first so its upsampled output fuses into the CCP conv epilogue.
    down = conv2d_p(x_psp, p["down_conv"], padding=1, act="relu")     # relu fused
    down = max_pool2d(down, 3, 3, 0, ceil_mode=False)
    x_ccp2 = conv2d_p(down, p["ccp2"], padding=1, act="relu")         # CCP stand-in
    up2 = upsample_bilinear_ac(x_ccp2, (x_psp.shape[1], x_psp.shape[2]))

    # x_ccp = ccp(x_psp) + upsample(x_ccp2)   (add fused into the CCP conv)
    x_ccp = conv2d_p(x_psp, p["ccp"], padding=1, act="relu",
                     extra=up2, extra_op="add")                       # CCP stand-in
    x_ccp = conv2d_p(x_ccp, p["conv_ccp"], padding=1)

    # res4_xccp = x_ccp * conv_res4(res4)          (mul fused into conv_res4)
    res4_xccp = mul_into_conv(x_ccp, res4, p["conv_res4"])
    y4 = pallas_elementwise_add(x_ccp, res4_xccp)

    # res3_res4_xccp = conv_inductionA(res4_xccp) * conv_res3(res3)
    indA = conv2d_p(res4_xccp, p["conv_inductionA"], padding=1)
    res3_res4_xccp = mul_into_conv(indA, res3, p["conv_res3"])
    # y3 = conv_inductionC(y4) + res3_res4_xccp    (add fused)
    y3 = conv2d_p(y4, p["conv_inductionC"], padding=1,
                  extra=res3_res4_xccp, extra_op="add")

    # res2_res3_res4_xccp = conv_inductionB(res3_res4_xccp) * conv_res2(res2)
    indB = conv2d_p(res3_res4_xccp, p["conv_inductionB"], padding=1)
    res2_res3_res4_xccp = mul_into_conv(indB, res2, p["conv_res2"])

    # y2 = deconv(conv_inductionD(y3)) + res2_res3_res4_xccp   (add fused)
    indD = conv2d_p(y3, p["conv_inductionD"], padding=1)
    y2 = conv_transpose2d(indD, p["deconv"], extra=res2_res3_res4_xccp)

    out = conv2d_p(y2, p["head"], padding=0)
    # convert back to NCHW to match the PyTorch module's output convention
    return [out.transpose(0, 3, 1, 2), x_dsn.transpose(0, 3, 1, 2)]


# ----------------------------------------------------------------------------
if __name__ == "__main__":
    num_classes = 5
    layers = [1, 1, 1, 1]          # one Bottleneck per stage (small test config)
    params = build_params(layers, num_classes)

    # input: NHWC, 3 channels; spatial 33 keeps every stage shape-consistent
    x = jax.random.normal(jax.random.PRNGKey(0), (1, 33, 33, 3), jnp.float32)

    out, x_dsn = resnet_forward(params, x)
    out = jax.block_until_ready(out)
    x_dsn = jax.block_until_ready(x_dsn)

    assert out.shape == (1, num_classes, 9, 9), out.shape
    assert x_dsn.shape == (1, num_classes, 5, 5), x_dsn.shape
    assert bool(jnp.all(jnp.isfinite(out))) and bool(jnp.all(jnp.isfinite(x_dsn)))
    print("KERNEL_OK")
</pallas_src>

<mosaic_0001>
module attributes {stable_mosaic.version = 11 : i64} {
  func.func @_mm_kernel(%arg0: i32, %arg1: i32, %arg2: i32, %arg3: memref<289x128xbf16, #tpu.memory_space<vmem>>, %arg4: memref<128x128xbf16, #tpu.memory_space<vmem>>, %arg5: memref<1x128xf32, #tpu.memory_space<vmem>>, %arg6: memref<1x128xf32, #tpu.memory_space<vmem>>, %arg7: memref<289x128xf32, #tpu.memory_space<vmem>>, %arg8: memref<289x128xf32, #tpu.memory_space<vmem>>) attributes {dimension_semantics = [#tpu.dimension_semantics<parallel>, #tpu.dimension_semantics<parallel>, #tpu.dimension_semantics<arbitrary>], iteration_bounds = array<i64: 1, 1, 1>, scalar_prefetch = 0 : i64, scratch_operands = 1 : i64, tpu.core_type = #tpu.core_type<tc>, window_params = [{transform_indices = @transform_0, window_bounds = array<i64: 289, 128>}, {transform_indices = @transform_1, window_bounds = array<i64: 128, 128>}, {transform_indices = @transform_2, window_bounds = array<i64: 1, 128>}, {transform_indices = @transform_3, window_bounds = array<i64: 1, 128>}, {transform_indices = @transform_4, window_bounds = array<i64: 289, 128>}]} {
    %c0_i32 = arith.constant 0 : i32
    %0 = arith.cmpi eq, %arg2, %c0_i32 : i32
    %1 = arith.extui %0 : i1 to i32
    %c0_i32_0 = arith.constant 0 : i32
    %2 = arith.cmpi ne, %1, %c0_i32_0 : i32
    scf.if %2 {
      %cst_10 = arith.constant 0.000000e+00 : f32
      %12 = vector.broadcast %cst_10 : f32 to vector<289x128xf32>
      %c0_11 = arith.constant 0 : index
      %c0_12 = arith.constant 0 : index
      %13 = vector.load %arg8[%c0_11, %c0_12] : memref<289x128xf32, #tpu.memory_space<vmem>>, vector<289x128xf32>
      tpu.vector_store %arg8[%c0_11, %c0_12], %12 {strides = array<i32>} : memref<289x128xf32, #tpu.memory_space<vmem>>, vector<289x128xf32>,
    } else {
    }
    %c0 = arith.constant 0 : index
    %c0_1 = arith.constant 0 : index
    %3 = vector.load %arg8[%c0, %c0_1] : memref<289x128xf32, #tpu.memory_space<vmem>>, vector<289x128xf32>
    %c0_2 = arith.constant 0 : index
    %c0_3 = arith.constant 0 : index
    %4 = vector.load %arg3[%c0_2, %c0_3] : memref<289x128xbf16, #tpu.memory_space<vmem>>, vector<289x128xbf16>
    %c0_4 = arith.constant 0 : index
    %c0_5 = arith.constant 0 : index
    %5 = vector.load %arg4[%c0_4, %c0_5] : memref<128x128xbf16, #tpu.memory_space<vmem>>, vector<128x128xbf16>
    %cst = arith.constant dense<0.000000e+00> : vector<289x128xf32>
    %6 = tpu.matmul %4, %5, %cst {dimension_numbers = #tpu.dot_dimension_numbers<[1], [0], [0], [1], [0, 0, 1, 1], [], []>} : vector<289x128xbf16>, vector<128x128xbf16>, vector<289x128xf32> -> vector<289x128xf32>
    %7 = arith.addf %3, %6 : vector<289x128xf32>
    %c0_6 = arith.constant 0 : index
    %c0_7 = arith.constant 0 : index
    %8 = vector.load %arg8[%c0_6, %c0_7] : memref<289x128xf32, #tpu.memory_space<vmem>>, vector<289x128xf32>
    tpu.vector_store %arg8[%c0_6, %c0_7], %7 {strides = array<i32>} : memref<289x128xf32, #tpu.memory_space<vmem>>, vector<289x128xf32>,
    %c0_i32_8 = arith.constant 0 : i32
    %9 = arith.cmpi eq, %arg2, %c0_i32_8 : i32
    %10 = arith.extui %9 : i1 to i32
    %c0_i32_9 = arith.constant 0 : i32
    %11 = arith.cmpi ne, %10, %c0_i32_9 : i32
    scf.if %11 {
      %c0_10 = arith.constant 0 : index
      %c0_11 = arith.constant 0 : index
      %12 = vector.load %arg8[%c0_10, %c0_11] : memref<289x128xf32, #tpu.memory_space<vmem>>, vector<289x128xf32>
      %c0_12 = arith.constant 0 : index
      %c0_13 = arith.constant 0 : index
      %13 = vector.load %arg5[%c0_12, %c0_13] : memref<1x128xf32, #tpu.memory_space<vmem>>, vector<1x128xf32>
      %14 = vector.broadcast %13 : vector<1x128xf32> to vector<289x128xf32>
      %15 = arith.mulf %12, %14 : vector<289x128xf32>
      %c0_14 = arith.constant 0 : index
      %c0_15 = arith.constant 0 : index
      %16 = vector.load %arg6[%c0_14, %c0_15] : memref<1x128xf32, #tpu.memory_space<vmem>>, vector<1x128xf32>
      %17 = vector.broadcast %16 : vector<1x128xf32> to vector<289x128xf32>
      %18 = arith.addf %15, %17 : vector<289x128xf32>
      %cst_16 = arith.constant 0.000000e+00 : f32
      %19 = vector.broadcast %cst_16 : f32 to vector<289x128xf32>
      %20 = arith.maximumf %18, %19 : vector<289x128xf32>
      %c0_17 = arith.constant 0 : index
      %c0_18 = arith.constant 0 : index
      %21 = vector.load %arg7[%c0_17, %c0_18] : memref<289x128xf32, #tpu.memory_space<vmem>>, vector<289x128xf32>
      tpu.vector_store %arg7[%c0_17, %c0_18], %20 {strides = array<i32>} : memref<289x128xf32, #tpu.memory_space<vmem>>, vector<289x128xf32>,
    } else {
    }
    return
  }
  func.func @transform_0(%arg0: i32, %arg1: i32, %arg2: i32) -> (i32, i32) {
    %c0_i32 = arith.constant 0 : i32
    return %arg0, %arg2 : i32, i32
  }
  func.func @transform_1(%arg0: i32, %arg1: i32, %arg2: i32) -> (i32, i32) {
    %c0_i32 = arith.constant 0 : i32
    return %arg2, %arg1 : i32, i32
  }
  func.func @transform_2(%arg0: i32, %arg1: i32, %arg2: i32) -> (i32, i32) {
    %c0_i32 = arith.constant 0 : i32
    %c0_i32_0 = arith.constant 0 : i32
    return %c0_i32, %arg1 : i32, i32
  }
  func.func @transform_3(%arg0: i32, %arg1: i32, %arg2: i32) -> (i32, i32) {
    %c0_i32 = arith.constant 0 : i32
    %c0_i32_0 = arith.constant 0 : i32
    return %c0_i32, %arg1 : i32, i32
  }
  func.func @transform_4(%arg0: i32, %arg1: i32, %arg2: i32) -> (i32, i32) {
    %c0_i32 = arith.constant 0 : i32
    return %arg0, %arg1 : i32, i32
  }
}

</mosaic_0001>

<bundles_post_ra>
// kernel: tpu_custom_call.1
= control target key start
LH: loop header
LB: loop body
LE: loop exit
PB: predicated region body
PF: predicated region fallthrough
CT: control target
= control target key end

     0   :  { %9 = vsyncpa [#allocation4], 0  ;;  %s1297_s0 = inlined_call_operand.hbm [shape: bf16[289,128], index: 0, kind: input, shape index: {}]   ;;  %s1298_s1 = inlined_call_operand.hbm [shape: bf16[128,128], index: 1, kind: input, shape index: {}]   ;;  %s1299_s2 = inlined_call_operand.vmem [shape: f32[1,128], index: 2, kind: input, shape index: {}]   ;;  %s1300_s3 = inlined_call_operand.vmem [shape: f32[1,128], index: 3, kind: input, shape index: {}]   ;;  %s1301_s4 = inlined_call_operand.hbm [shape: f32[289,128], index: 4, kind: output, shape index: {}]  }
   0x1   :  { %10 = vsyncpa [#allocation7], 0 }
   0x2   :  { %11 = vsyncpa [#allocation5], 0  ;;  %s1088_s15 = smov [#allocation3]   ;;  %s1016_s19 = scalar_lea.hbm %s1297_s0, 2368 }
   0x3   :  { %s17_s16 = sshll.u32 %s1088_s15, 4  ;;  %p1017_p0 = scmp.ne.s32.totalorder %s1297_s0, %s1016_s19  ;;  %s18_s16 = int_to_ptr.vmem [resolvable:$true] %s17_s16 }
   0x4   :  { %p1020_p1 = scmp.lt.u32.totalorder %s1016_s19, %s1297_s0 }
   0x6   :  { %p1022_p2 = pnand %p1020_p1, %p1017_p0 }
   0x8   :  { %1025 = shalt.err (!%p1022_p2)
}
   0x9   :  { %s1026_s24 = scalar_lea.vmem %s18_s16, 2368  ;;  %p1031_p4 = scmp.lt.s32.totalorder %s18_s16, %s18_s16 }
   0xa   :  { %p1027_p3 = scmp.ne.s32.totalorder %s18_s16, %s1026_s24  ;;  %p1032_p5 = scmp.lt.s32.totalorder %s1026_s24, %s1026_s24 }
   0xc   :  { %p1033_p6 = por %p1032_p5, %p1031_p4 }
   0xe   :  { %p1034_p7 = pnand %p1033_p6, %p1027_p3 }
  0x10   :  { %1037 = shalt.err (!%p1034_p7)
}
  0x11   :  { %s1089_s25 = smov 64   ;;  %s1090_s26 = smov 4  }
  0x12   :  { %23 = dma.hbm_to_vmem [thread:$0]  %s1297_s0, 2368, %s18_s16, [#allocation4], %s1089_s25, %s1089_s25, %s1090_s26  }
  0x13   :  { %s1091_s29 = smov [#allocation6]   ;;  %s1038_s7 = scalar_lea.hbm %s1298_s1, 1024 }
  0x14   :  { %s29_s30 = sshll.u32 %s1091_s29, 4  ;;  %p1039_p8 = scmp.ne.s32.totalorder %s1298_s1, %s1038_s7  ;;  %s30_s30 = int_to_ptr.vmem [resolvable:$true] %s29_s30 }
  0x15   :  { %p1042_p9 = scmp.lt.u32.totalorder %s1038_s7, %s1298_s1 }
  0x17   :  { %p1044_p10 = pnand %p1042_p9, %p1039_p8 }
  0x19   :  { %1047 = shalt.err (!%p1044_p10)
}
  0x1a   :  { %s1048_s12 = scalar_lea.vmem %s30_s30, 1024  ;;  %p1053_p12 = scmp.lt.s32.totalorder %s30_s30, %s30_s30 }
  0x1b   :  { %p1049_p11 = scmp.ne.s32.totalorder %s30_s30, %s1048_s12  ;;  %p1054_p13 = scmp.lt.s32.totalorder %s1048_s12, %s1048_s12 }
  0x1d   :  { %p1055_p0 = por %p1054_p13, %p1053_p12 }
  0x1f   :  { %p1056_p1 = pnand %p1055_p0, %p1049_p11 }
  0x21   :  { %1059 = shalt.err (!%p1056_p1)
}
  0x22   :  { %35 = dma.hbm_to_vmem [thread:$0]  %s1298_s1, 1024, %s30_s30, [#allocation7], %s1089_s25, %s1089_s25, %s1090_s26  }
  0x23   :  { %1082 = dma.done.wait [#allocation4], 2368  }
  0x24   :  { %1083 = vsyncadd [#allocation4], 4294964928 }
  0x25   :  { %1084 = dma.done.wait [#allocation7], 1024  }
  0x26   :  { %1085 = vsyncadd [#allocation7], 4294966272  ;;  %v1092_v0 = vmov 0.0   ;;  %vm1093_vm0 = vmmov 0   ;;  %v989_v1 = vld [vmem:[#allocation6] sm:$0xff]   ;;  %v990_v2 = vld [vmem:[#allocation6 + $0x8] sm:$0xff]  }
  0x27   :  { %872 = vmatprep.subr.bf16.mxu0 %v1092_v0  ;;  %87 = vst [vmem:[#allocation2 + $0x120] sm:$0x1] %v1092_v0  ;;  %964 = vmatprep.subr.bf16.mxu1 %v1092_v0  ;;  %v991_v3 = vld [vmem:[#allocation6 + $0x10] sm:$0xff]   ;;  %v992_v4 = vld [vmem:[#allocation6 + $0x18] sm:$0xff]   ;;  %v993_v5 = vld [vmem:[#allocation6 + $0x20] sm:$0xff]  }
  0x28   :  { %888 = vmatprep.mubr.msk.bf16.mxu0 %vm1093_vm0, %v1092_v0  ;;  %928 = vmatprep.mubr.msk.bf16.mxu1 %vm1093_vm0, %v1092_v0  ;;  %v994_v6 = vld [vmem:[#allocation6 + $0x28] sm:$0xff]   ;;  %v995_v7 = vld [vmem:[#allocation6 + $0x30] sm:$0xff]   ;;  %v996_v8 = vld [vmem:[#allocation6 + $0x38] sm:$0xff]  }
  0x29   :  { %873 = vmatpush3.bf16.msra.mxu0 %v989_v1  ;;  %972 = vmatpush3.bf16.msra.mxu1 %v989_v1  ;;  %v997_v9 = vld [vmem:[#allocation3] sm:$0xff]   ;;  %v998_v10 = vld [vmem:[#allocation3 + $0x50] sm:$0xff]   ;;  %v999_v11 = vld [vmem:[#allocation3 + $0x8] sm:$0xff]  }
  0x2a   :  { %874 = vmatprep.subr.bf16.mxu0 %v1092_v0  ;;  %965 = vmatprep.subr.bf16.mxu1 %v1092_v0  ;;  %v1000_v12 = vld [vmem:[#allocation3 + $0x58] sm:$0xff]   ;;  %v1001_v13 = vld [vmem:[#allocation3 + $0x10] sm:$0xff]   ;;  %v1002_v14 = vld [vmem:[#allocation3 + $0x60] sm:$0xff]  }
  0x2b   :  { %v1003_v15 = vld [vmem:[#allocation3 + $0x18] sm:$0xff]   ;;  %v1004_v16 = vld [vmem:[#allocation3 + $0x68] sm:$0xff]   ;;  %v1005_v17 = vld [vmem:[#allocation3 + $0x20] sm:$0xff]  }
  0x2c   :  { %v1006_v18 = vld [vmem:[#allocation3 + $0x70] sm:$0xff]   ;;  %v1007_v19 = vld [vmem:[#allocation3 + $0x28] sm:$0xff]   ;;  %v1008_v20 = vld [vmem:[#allocation3 + $0x78] sm:$0xff]  }
  0x2d   :  { %875 = vmatpush3.bf16.msra.mxu0 %v990_v2  ;;  %973 = vmatpush3.bf16.msra.mxu1 %v990_v2  ;;  %v1009_v21 = vld [vmem:[#allocation3 + $0x30] sm:$0xff]   ;;  %v1010_v22 = vld [vmem:[#allocation3 + $0x80] sm:$0xff]   ;;  %v1011_v23 = vld [vmem:[#allocation3 + $0x38] sm:$0xff]  }
  0x2e   :  { %876 = vmatprep.subr.bf16.mxu0 %v1092_v0  ;;  %966 = vmatprep.subr.bf16.mxu1 %v1092_v0  ;;  %v1012_v24 = vld [vmem:[#allocation3 + $0x88] sm:$0xff]   ;;  %v1013_v25 = vld [vmem:[#allocation3 + $0x40] sm:$0xff]   ;;  %v1014_v26 = vld [vmem:[#allocation3 + $0x90] ss:$0 sps:$4 sm:$0x11]  }
  0x2f   :  { %v1015_v27 = vld [vmem:[#allocation3 + $0x48] sm:$0xff]   ;;  %v1204_v29 = vld [vmem:[%s1299_s2] ss:$0 sm:$0xff]  ;;  %s1094_s2 = smov [#allocation8]  }
  0x30   :  { %v1209_v33 = vld [vmem:[%s1300_s3] ss:$0 sm:$0xff]  ;;  %s803_s3 = sshll.u32 %s1094_s2, 4  ;;  %s804_s3 = int_to_ptr.vmem [resolvable:$true] %s803_s3 }
  0x31   :  { %877 = vmatpush3.bf16.msra.mxu0 %v991_v3  ;;  %974 = vmatpush3.bf16.msra.mxu1 %v991_v3  ;;  %s1060_s17 = scalar_lea.vmem %s804_s3, 4736  ;;  %p1065_p3 = scmp.lt.s32.totalorder %s804_s3, %s804_s3 }
  0x32   :  { %878 = vmatprep.subr.bf16.mxu0 %v1092_v0  ;;  %967 = vmatprep.subr.bf16.mxu1 %v1092_v0  ;;  %p1061_p2 = scmp.ne.s32.totalorder %s804_s3, %s1060_s17  ;;  %p1066_p4 = scmp.lt.s32.totalorder %s1060_s17, %s1060_s17 }
  0x34   :  { %p1067_p5 = por %p1066_p4, %p1065_p3 }
  0x35   :  { %879 = vmatpush3.bf16.msra.mxu0 %v992_v4  ;;  %975 = vmatpush3.bf16.msra.mxu1 %v992_v4 }
  0x36   :  { %880 = vmatprep.subr.bf16.mxu0 %v1092_v0  ;;  %968 = vmatprep.subr.bf16.mxu1 %v1092_v0  ;;  %p1068_p6 = pnand %p1067_p5, %p1061_p2 }
  0x39   :  { %881 = vmatpush3.bf16.msra.mxu0 %v993_v5  ;;  %976 = vmatpush3.bf16.msra.mxu1 %v993_v5 }
  0x3a   :  { %882 = vmatprep.subr.bf16.mxu0 %v1092_v0  ;;  %969 = vmatprep.subr.bf16.mxu1 %v1092_v0 }
  0x3d   :  { %883 = vmatpush3.bf16.msra.mxu0 %v994_v6  ;;  %977 = vmatpush3.bf16.msra.mxu1 %v994_v6 }
  0x3e   :  { %884 = vmatprep.subr.bf16.mxu0 %v1092_v0  ;;  %970 = vmatprep.subr.bf16.mxu1 %v1092_v0 }
  0x41   :  { %885 = vmatpush3.bf16.msra.mxu0 %v995_v7  ;;  %978 = vmatpush3.bf16.msra.mxu1 %v995_v7 }
  0x42   :  { %886 = vmatprep.subr.bf16.mxu0 %v1092_v0  ;;  %971 = vmatprep.subr.bf16.mxu1 %v1092_v0 }
  0x45   :  { %887 = vmatpush3.bf16.msra.mxu0 %v996_v8  ;;  %979 = vmatpush3.bf16.msra.mxu1 %v996_v8 }
  0x48   :  { %889 = vmatmul.mubr.bf16.vlgmr.msra.gmra.mrb[0].mxu0 %v997_v9  ;;  %929 = vmatmul.mubr.bf16.vlgmr.msra.gmra.mrb[0].mxu1 %v998_v10 }
  0x49   :  { %892 = vmatprep.mubr.msk.bf16.mxu0 %vm1093_vm0, %v1092_v0  ;;  %932 = vmatprep.mubr.msk.bf16.mxu1 %vm1093_vm0, %v1092_v0 }
  0x50   :  { %893 = vmatmul.mubr.bf16.gmra.mrb[4].mxu0 %v999_v11  ;;  %933 = vmatmul.mubr.bf16.gmra.mrb[4].mxu1 %v1000_v12 }
  0x51   :  { %896 = vmatprep.mubr.msk.bf16.mxu0 %vm1093_vm0, %v1092_v0  ;;  %936 = vmatprep.mubr.msk.bf16.mxu1 %vm1093_vm0, %v1092_v0 }
  0x58   :  { %897 = vmatmul.mubr.bf16.gmra.mrb[8].mxu0 %v1001_v13  ;;  %937 = vmatmul.mubr.bf16.gmra.mrb[8].mxu1 %v1002_v14 }
  0x59   :  { %900 = vmatprep.mubr.msk.bf16.mxu0 %vm1093_vm0, %v1092_v0  ;;  %940 = vmatprep.mubr.msk.bf16.mxu1 %vm1093_vm0, %v1092_v0 }
  0x60   :  { %901 = vmatmul.mubr.bf16.gmra.mrb[12].mxu0 %v1003_v15  ;;  %941 = vmatmul.mubr.bf16.gmra.mrb[12].mxu1 %v1004_v16 }
  0x61   :  { %904 = vmatprep.mubr.msk.bf16.mxu0 %vm1093_vm0, %v1092_v0  ;;  %944 = vmatprep.mubr.msk.bf16.mxu1 %vm1093_vm0, %v1092_v0 }
  0x68   :  { %905 = vmatmul.mubr.bf16.gmra.mrb[16].mxu0 %v1005_v17  ;;  %945 = vmatmul.mubr.bf16.gmra.mrb[16].mxu1 %v1006_v18 }
  0x69   :  { %908 = vmatprep.mubr.msk.bf16.mxu0 %vm1093_vm0, %v1092_v0  ;;  %948 = vmatprep.mubr.msk.bf16.mxu1 %vm1093_vm0, %v1092_v0 }
  0x70   :  { %909 = vmatmul.mubr.bf16.gmra.mrb[20].mxu0 %v1007_v19  ;;  %949 = vmatmul.mubr.bf16.gmra.mrb[20].mxu1 %v1008_v20 }
  0x71   :  { %912 = vmatprep.mubr.msk.bf16.mxu0 %vm1093_vm0, %v1092_v0  ;;  %952 = vmatprep.mubr.msk.bf16.mxu1 %vm1093_vm0, %v1092_v0 }
  0x78   :  { %913 = vmatmul.mubr.bf16.gmra.mrb[24].mxu0 %v1009_v21  ;;  %953 = vmatmul.mubr.bf16.gmra.mrb[24].mxu1 %v1010_v22 }
  0x79   :  { %916 = vmatprep.mubr.msk.bf16.mxu0 %vm1093_vm0, %v1092_v0  ;;  %956 = vmatprep.mubr.msk.bf16.mxu1 %vm1093_vm0, %v1092_v0 }
  0x80   :  { %917 = vmatmul.mubr.bf16.gmra.mrb[28].mxu0 %v1011_v23  ;;  %957 = vmatmul.mubr.bf16.gmra.mrb[28].mxu1 %v1012_v24 }
  0x81   :  { %920 = vmatprep.mubr.msk.bf16.mxu0 %vm1093_vm0, %v1092_v0  ;;  %960 = vmatprep.mubr.msk.bf16.mxu1 %vm1093_vm0, %v1092_v0 }
  0x88   :  { %921 = vmatmul.mubr.bf16.gmra.mrb[32].mxu0 %v1013_v25  ;;  %961 = vmatmul.mubr.bf16.gmra.mrb[32].mxu1 %v1014_v26 }
  0x89   :  { %924 = vmatprep.mubr.msk.bf16.mxu0 %vm1093_vm0, %v1092_v0 }
  0x90   :  { %925 = vmatmul.mubr.bf16.gmra.mrb[36].mxu0 %v1015_v27 }
 0x11b   :  { %v372_v28 = vpop.f32.mrb[0].mxu0  ;;  %v452_v30 = vpop.f32.mrb[0].mxu1 }
 0x11c   :  { %v890_v31 = vpop.f32.mrb[1].mxu0  ;;  %v930_v32 = vpop.f32.mrb[1].mxu1  ;;  %v643_v36 = vmul.f32 %v1204_v29, %v372_v28  ;;  %v663_v38 = vmul.f32 %v1204_v29, %v452_v30 }
 0x11d   :  { %v375_v34 = vpop.f32.mrb[2].mxu0  ;;  %v455_v35 = vpop.f32.mrb[2].mxu1 }
 0x11e   :  { %v891_v37 = vpop.f32.mrb[3].mxu0  ;;  %v931_v39 = vpop.f32.mrb[3].mxu1  ;;  %v687_v40 = vadd.f32 %v1209_v33, %v643_v36  ;;  %v644_v41 = vmul.f32 %v1204_v29, %v375_v34  ;;  %v707_v42 = vadd.f32 %v1209_v33, %v663_v38  ;;  %v664_v43 = vmul.f32 %v1204_v29, %v455_v35 }
 0x120   :  { %v724_v44 = vmax.f32 %v687_v40, 0.0  ;;  %v688_v45 = vadd.f32 %v1209_v33, %v644_v41  ;;  %v744_v46 = vmax.f32 %v707_v42, 0.0  ;;  %v708_v47 = vadd.f32 %v1209_v33, %v664_v43 }
 0x122   :  { %761 = vst [vmem:[#allocation8] sm:$0xff] %v724_v44  ;;  %v725_v50 = vmax.f32 %v688_v45, 0.0  ;;  %781 = vst [vmem:[#allocation8 + $0xa0] sm:$0xff] %v744_v46  ;;  %v745_v52 = vmax.f32 %v708_v47, 0.0 }
 0x123   :  { %v380_v48 = vpop.f32.mrb[4].mxu0  ;;  %v460_v49 = vpop.f32.mrb[4].mxu1 }
 0x124   :  { %v894_v51 = vpop.f32.mrb[5].mxu0  ;;  %v934_v53 = vpop.f32.mrb[5].mxu1  ;;  %762 = vst [vmem:[#allocation8 + $0x8] sm:$0xff] %v725_v50  ;;  %v645_v56 = vmul.f32 %v1204_v29, %v380_v48  ;;  %782 = vst [vmem:[#allocation8 + $0xa8] sm:$0xff] %v745_v52  ;;  %v665_v58 = vmul.f32 %v1204_v29, %v460_v49 }
 0x125   :  { %v383_v54 = vpop.f32.mrb[6].mxu0  ;;  %v463_v55 = vpop.f32.mrb[6].mxu1 }
 0x126   :  { %v895_v57 = vpop.f32.mrb[7].mxu0  ;;  %v935_v59 = vpop.f32.mrb[7].mxu1  ;;  %v689_v60 = vadd.f32 %v1209_v33, %v645_v56  ;;  %v646_v61 = vmul.f32 %v1204_v29, %v383_v54  ;;  %v709_v62 = vadd.f32 %v1209_v33, %v665_v58  ;;  %v666_v63 = vmul.f32 %v1204_v29, %v463_v55 }
 0x128   :  { %v726_v0 = vmax.f32 %v689_v60, 0.0  ;;  %v690_v1 = vadd.f32 %v1209_v33, %v646_v61  ;;  %v746_v2 = vmax.f32 %v709_v62, 0.0  ;;  %v710_v3 = vadd.f32 %v1209_v33, %v666_v63 }
 0x12a   :  { %763 = vst [vmem:[#allocation8 + $0x10] sm:$0xff] %v726_v0  ;;  %v727_v6 = vmax.f32 %v690_v1, 0.0  ;;  %783 = vst [vmem:[#allocation8 + $0xb0] sm:$0xff] %v746_v2  ;;  %v747_v8 = vmax.f32 %v710_v3, 0.0 }
 0x12b   :  { %v388_v4 = vpop.f32.mrb[8].mxu0  ;;  %v468_v5 = vpop.f32.mrb[8].mxu1 }
 0x12c   :  { %v898_v7 = vpop.f32.mrb[9].mxu0  ;;  %v938_v9 = vpop.f32.mrb[9].mxu1  ;;  %764 = vst [vmem:[#allocation8 + $0x18] sm:$0xff] %v727_v6  ;;  %v647_v12 = vmul.f32 %v1204_v29, %v388_v4  ;;  %784 = vst [vmem:[#allocation8 + $0xb8] sm:$0xff] %v747_v8  ;;  %v667_v14 = vmul.f32 %v1204_v29, %v468_v5 }
 0x12d   :  { %v391_v10 = vpop.f32.mrb[10].mxu0  ;;  %v471_v11 = vpop.f32.mrb[10].mxu1 }
 0x12e   :  { %v899_v13 = vpop.f32.mrb[11].mxu0  ;;  %v939_v15 = vpop.f32.mrb[11].mxu1  ;;  %v691_v16 = vadd.f32 %v1209_v33, %v647_v12  ;;  %v648_v17 = vmul.f32 %v1204_v29, %v391_v10  ;;  %v711_v18 = vadd.f32 %v1209_v33, %v667_v14  ;;  %v668_v19 = vmul.f32 %v1204_v29, %v471_v11 }
 0x130   :  { %v728_v20 = vmax.f32 %v691_v16, 0.0  ;;  %v692_v21 = vadd.f32 %v1209_v33, %v648_v17  ;;  %v748_v22 = vmax.f32 %v711_v18, 0.0  ;;  %v712_v23 = vadd.f32 %v1209_v33, %v668_v19 }
 0x132   :  { %765 = vst [vmem:[#allocation8 + $0x20] sm:$0xff] %v728_v20  ;;  %v729_v26 = vmax.f32 %v692_v21, 0.0  ;;  %785 = vst [vmem:[#allocation8 + $0xc0] sm:$0xff] %v748_v22  ;;  %v749_v28 = vmax.f32 %v712_v23, 0.0 }
 0x133   :  { %v396_v24 = vpop.f32.mrb[12].mxu0  ;;  %v476_v25 = vpop.f32.mrb[12].mxu1 }
 0x134   :  { %v902_v27 = vpop.f32.mrb[13].mxu0  ;;  %v942_v30 = vpop.f32.mrb[13].mxu1  ;;  %766 = vst [vmem:[#allocation8 + $0x28] sm:$0xff] %v729_v26  ;;  %v649_v34 = vmul.f32 %v1204_v29, %v396_v24  ;;  %786 = vst [vmem:[#allocation8 + $0xc8] sm:$0xff] %v749_v28  ;;  %v669_v36 = vmul.f32 %v1204_v29, %v476_v25 }
 0x135   :  { %v399_v31 = vpop.f32.mrb[14].mxu0  ;;  %v479_v32 = vpop.f32.mrb[14].mxu1 }
 0x136   :  { %v903_v35 = vpop.f32.mrb[15].mxu0  ;;  %v943_v37 = vpop.f32.mrb[15].mxu1  ;;  %v693_v38 = vadd.f32 %v1209_v33, %v649_v34  ;;  %v650_v39 = vmul.f32 %v1204_v29, %v399_v31  ;;  %v713_v40 = vadd.f32 %v1209_v33, %v669_v36  ;;  %v670_v41 = vmul.f32 %v1204_v29, %v479_v32 }
 0x138   :  { %v730_v42 = vmax.f32 %v693_v38, 0.0  ;;  %v694_v43 = vadd.f32 %v1209_v33, %v650_v39  ;;  %v750_v44 = vmax.f32 %v713_v40, 0.0  ;;  %v714_v45 = vadd.f32 %v1209_v33, %v670_v41 }
 0x13a   :  { %767 = vst [vmem:[#allocation8 + $0x30] sm:$0xff] %v730_v42  ;;  %v731_v48 = vmax.f32 %v694_v43, 0.0  ;;  %787 = vst [vmem:[#allocation8 + $0xd0] sm:$0xff] %v750_v44  ;;  %v751_v50 = vmax.f32 %v714_v45, 0.0 }
 0x13b   :  { %v404_v46 = vpop.f32.mrb[16].mxu0  ;;  %v484_v47 = vpop.f32.mrb[16].mxu1 }
 0x13c   :  { %v906_v49 = vpop.f32.mrb[17].mxu0  ;;  %v946_v51 = vpop.f32.mrb[17].mxu1  ;;  %768 = vst [vmem:[#allocation8 + $0x38] sm:$0xff] %v731_v48  ;;  %v651_v54 = vmul.f32 %v1204_v29, %v404_v46  ;;  %788 = vst [vmem:[#allocation8 + $0xd8] sm:$0xff] %v751_v50  ;;  %v671_v56 = vmul.f32 %v1204_v29, %v484_v47 }
 0x13d   :  { %v407_v52 = vpop.f32.mrb[18].mxu0  ;;  %v487_v53 = vpop.f32.mrb[18].mxu1 }
 0x13e   :  { %v907_v55 = vpop.f32.mrb[19].mxu0  ;;  %v947_v57 = vpop.f32.mrb[19].mxu1  ;;  %v695_v58 = vadd.f32 %v1209_v33, %v651_v54  ;;  %v652_v59 = vmul.f32 %v1204_v29, %v407_v52  ;;  %v715_v60 = vadd.f32 %v1209_v33, %v671_v56  ;;  %v672_v61 = vmul.f32 %v1204_v29, %v487_v53 }
 0x140   :  { %v732_v62 = vmax.f32 %v695_v58, 0.0  ;;  %v696_v63 = vadd.f32 %v1209_v33, %v652_v59  ;;  %v752_v0 = vmax.f32 %v715_v60, 0.0  ;;  %v716_v1 = vadd.f32 %v1209_v33, %v672_v61  ;;  %v124_v60 = vld [vmem:[#allocation2 + $0x120] sm:$0x1] }
 0x142   :  { %769 = vst [vmem:[#allocation8 + $0x40] sm:$0xff] %v732_v62  ;;  %v733_v4 = vmax.f32 %v696_v63, 0.0  ;;  %789 = vst [vmem:[#allocation8 + $0xe0] sm:$0xff] %v752_v0  ;;  %v753_v6 = vmax.f32 %v716_v1, 0.0 }
 0x143   :  { %v412_v2 = vpop.f32.mrb[20].mxu0  ;;  %v492_v3 = vpop.f32.mrb[20].mxu1 }
 0x144   :  { %v910_v5 = vpop.f32.mrb[21].mxu0  ;;  %v950_v7 = vpop.f32.mrb[21].mxu1  ;;  %770 = vst [vmem:[#allocation8 + $0x48] sm:$0xff] %v733_v4  ;;  %v653_v10 = vmul.f32 %v1204_v29, %v412_v2  ;;  %790 = vst [vmem:[#allocation8 + $0xe8] sm:$0xff] %v753_v6  ;;  %v673_v12 = vmul.f32 %v1204_v29, %v492_v3 }
 0x145   :  { %v415_v8 = vpop.f32.mrb[22].mxu0  ;;  %v495_v9 = vpop.f32.mrb[22].mxu1 }
 0x146   :  { %v911_v11 = vpop.f32.mrb[23].mxu0  ;;  %v951_v13 = vpop.f32.mrb[23].mxu1  ;;  %v697_v14 = vadd.f32 %v1209_v33, %v653_v10  ;;  %v654_v15 = vmul.f32 %v1204_v29, %v415_v8  ;;  %v717_v16 = vadd.f32 %v1209_v33, %v673_v12  ;;  %v674_v17 = vmul.f32 %v1204_v29, %v495_v9 }
 0x148   :  { %v734_v18 = vmax.f32 %v697_v14, 0.0  ;;  %v698_v19 = vadd.f32 %v1209_v33, %v654_v15  ;;  %v754_v20 = vmax.f32 %v717_v16, 0.0  ;;  %v718_v21 = vadd.f32 %v1209_v33, %v674_v17 }
 0x14a   :  { %771 = vst [vmem:[#allocation8 + $0x50] sm:$0xff] %v734_v18  ;;  %v735_v24 = vmax.f32 %v698_v19, 0.0  ;;  %791 = vst [vmem:[#allocation8 + $0xf0] sm:$0xff] %v754_v20  ;;  %v755_v26 = vmax.f32 %v718_v21, 0.0 }
 0x14b   :  { %v420_v22 = vpop.f32.mrb[24].mxu0  ;;  %v500_v23 = vpop.f32.mrb[24].mxu1 }
 0x14c   :  { %v914_v25 = vpop.f32.mrb[25].mxu0  ;;  %v954_v27 = vpop.f32.mrb[25].mxu1  ;;  %772 = vst [vmem:[#allocation8 + $0x58] sm:$0xff] %v735_v24  ;;  %v655_v31 = vmul.f32 %v1204_v29, %v420_v22  ;;  %792 = vst [vmem:[#allocation8 + $0xf8] sm:$0xff] %v755_v26  ;;  %v675_v34 = vmul.f32 %v1204_v29, %v500_v23 }
 0x14d   :  { %v423_v28 = vpop.f32.mrb[26].mxu0  ;;  %v503_v30 = vpop.f32.mrb[26].mxu1 }
 0x14e   :  { %v915_v32 = vpop.f32.mrb[27].mxu0  ;;  %v955_v35 = vpop.f32.mrb[27].mxu1  ;;  %v699_v36 = vadd.f32 %v1209_v33, %v655_v31  ;;  %v656_v37 = vmul.f32 %v1204_v29, %v423_v28  ;;  %v719_v38 = vadd.f32 %v1209_v33, %v675_v34  ;;  %v676_v39 = vmul.f32 %v1204_v29, %v503_v30 }
 0x150   :  { %v736_v40 = vmax.f32 %v699_v36, 0.0  ;;  %v700_v41 = vadd.f32 %v1209_v33, %v656_v37  ;;  %v756_v42 = vmax.f32 %v719_v38, 0.0  ;;  %v720_v43 = vadd.f32 %v1209_v33, %v676_v39 }
 0x152   :  { %773 = vst [vmem:[#allocation8 + $0x60] sm:$0xff] %v736_v40  ;;  %v737_v46 = vmax.f32 %v700_v41, 0.0  ;;  %793 = vst [vmem:[#allocation8 + $0x100] sm:$0xff] %v756_v42  ;;  %v757_v48 = vmax.f32 %v720_v43, 0.0 }
 0x153   :  { %v428_v44 = vpop.f32.mrb[28].mxu0  ;;  %v508_v45 = vpop.f32.mrb[28].mxu1 }
 0x154   :  { %v918_v47 = vpop.f32.mrb[29].mxu0  ;;  %v958_v49 = vpop.f32.mrb[29].mxu1  ;;  %774 = vst [vmem:[#allocation8 + $0x68] sm:$0xff] %v737_v46  ;;  %v657_v52 = vmul.f32 %v1204_v29, %v428_v44  ;;  %794 = vst [vmem:[#allocation8 + $0x108] sm:$0xff] %v757_v48  ;;  %v677_v54 = vmul.f32 %v1204_v29, %v508_v45 }
 0x155   :  { %v431_v50 = vpop.f32.mrb[30].mxu0  ;;  %v511_v51 = vpop.f32.mrb[30].mxu1 }
 0x156   :  { %v919_v53 = vpop.f32.mrb[31].mxu0  ;;  %v959_v55 = vpop.f32.mrb[31].mxu1  ;;  %v701_v56 = vadd.f32 %v1209_v33, %v657_v52  ;;  %v658_v57 = vmul.f32 %v1204_v29, %v431_v50  ;;  %v721_v58 = vadd.f32 %v1209_v33, %v677_v54  ;;  %v678_v59 = vmul.f32 %v1204_v29, %v511_v51 }
 0x158   :  { %v738_v61 = vmax.f32 %v701_v56, 0.0  ;;  %v702_v62 = vadd.f32 %v1209_v33, %v658_v57  ;;  %v758_v63 = vmax.f32 %v721_v58, 0.0  ;;  %v722_v0 = vadd.f32 %v1209_v33, %v678_v59 }
 0x15a   :  { %775 = vst [vmem:[#allocation8 + $0x70] sm:$0xff] %v738_v61  ;;  %v739_v3 = vmax.f32 %v702_v62, 0.0  ;;  %795 = vst [vmem:[#allocation8 + $0x110] sm:$0xff] %v758_v63  ;;  %v759_v5 = vmax.f32 %v722_v0, 0.0 }
 0x15b   :  { %v436_v1 = vpop.f32.mrb[32].mxu0  ;;  %v516_v2 = vpop.f32.mrb[32].mxu1 }
 0x15c   :  { %v922_v4 = vpop.f32.mrb[33].mxu0  ;;  %v558_v6 = vadd.f32 %v516_v2, %v124_v60  ;;  %v962_v7 = vpop.f32.mrb[33].mxu1  ;;  %776 = vst [vmem:[#allocation8 + $0x78] sm:$0xff] %v739_v3  ;;  %v659_v10 = vmul.f32 %v1204_v29, %v436_v1  ;;  %796 = vst [vmem:[#allocation8 + $0x118] sm:$0xff] %v759_v5 }
 0x15d   :  { %v439_v8 = vpop.f32.mrb[34].mxu0  ;;  %v519_v9 = vpop.f32.mrb[34].mxu1 }
 0x15e   :  { %v923_v11 = vpop.f32.mrb[35].mxu0  ;;  %595 = vst [vmem:[#allocation2 + $0x120] sm:$0x1] %v558_v6  ;;  %v963_v12 = vpop.f32.mrb[35].mxu1  ;;  %v703_v13 = vadd.f32 %v1209_v33, %v659_v10  ;;  %v660_v14 = vmul.f32 %v1204_v29, %v439_v8 }
 0x160   :  { %v740_v15 = vmax.f32 %v703_v13, 0.0  ;;  %v704_v16 = vadd.f32 %v1209_v33, %v660_v14 }
 0x162   :  { %777 = vst [vmem:[#allocation8 + $0x80] sm:$0xff] %v740_v15  ;;  %v741_v18 = vmax.f32 %v704_v16, 0.0 }
 0x163   :  { %v444_v17 = vpop.f32.mrb[36].mxu0 }
 0x164   :  { %v926_v19 = vpop.f32.mrb[37].mxu0  ;;  %778 = vst [vmem:[#allocation8 + $0x88] sm:$0xff] %v741_v18  ;;  %v661_v23 = vmul.f32 %v1204_v29, %v444_v17 }
 0x165   :  { %v635_v20 = vld [vmem:[#allocation2 + $0x120] sm:$0x1]  ;;  %v447_v21 = vpop.f32.mrb[38].mxu0 }
 0x166   :  { %v679_v22 = vmul.f32 %v1204_v29, %v635_v20  ;;  %v927_v24 = vpop.f32.mrb[39].mxu0  ;;  %v705_v26 = vadd.f32 %v1209_v33, %v661_v23  ;;  %v662_v27 = vmul.f32 %v1204_v29, %v447_v21 }
 0x168   :  { %v723_v25 = vadd.f32 %v1209_v33, %v679_v22  ;;  %v742_v30 = vmax.f32 %v705_v26, 0.0  ;;  %v706_v31 = vadd.f32 %v1209_v33, %v662_v27 }
 0x16a   :  { %v760_v28 = vmax.f32 %v723_v25, 0.0  ;;  %779 = vst [vmem:[#allocation8 + $0x90] sm:$0xff] %v742_v30  ;;  %v743_v32 = vmax.f32 %v706_v31, 0.0 }
 0x16c   :  { %797 = vst [vmem:[#allocation8 + $0x120] sm:$0x1] %v760_v28  ;;  %780 = vst [vmem:[#allocation8 + $0x98] sm:$0xff] %v743_v32 }
 0x16d   :  { %1071 = shalt.err (!%p1068_p6)
}
 0x16e   :  { %s1072_s20 = scalar_lea.hbm %s1301_s4, 4736 }
 0x16f   :  { %p1073_p7 = scmp.ne.s32.totalorder %s1301_s4, %s1072_s20  ;;  %p1076_p8 = scmp.lt.u32.totalorder %s1072_s20, %s1301_s4 }
 0x171   :  { %p1078_p9 = pnand %p1076_p8, %p1073_p7 }
 0x173   :  { %1081 = shalt.err (!%p1078_p9)
}
 0x174   :  { %s1095_s25 = smov 128   ;;  %s1096_s26 = smov 8  }
 0x175   :  { %809 = dma.vmem_to_hbm [thread:$0]  %s804_s3, 4736, %s1301_s4, [#allocation5], %s1095_s25, %s1095_s25, %s1096_s26  }
 0x176   :  { %1086 = dma.done.wait [#allocation5], 4736  }
 0x177   :  { %1087 = vsyncadd [#allocation5], 4294962560 }
 0x178   :  { %813 = vsyncpa [#allocation4], 1 }
 0x179   :  { %814 = vsyncpa [#allocation7], 1 }
 0x17a   :  { %815 = vsyncpa [#allocation5], 1 }

</bundles_post_ra>
